<compile_context>
chip_gen: v6e
topology: v6e:2x2x1
jax: 0.10.0
libtpu: 0.0.40
codegen_flags: <defaults>
</compile_context>

<pallas_src>
import jax
import jax.numpy as jnp
from jax.experimental import pallas as pl
from jax.experimental.pallas import tpu as pltpu


# ---------------------------------------------------------------------------
# Pallas kernel: dominant covariance contraction (+ fused low-rank term)
#   cov = sum_c Q_c @ covar_U @ Q_c^T  +  M covar_x0 M^T
# ---------------------------------------------------------------------------
def _make_cov_kernel(compute_dtype):
    def kernel(covu_ref, q_ref, qt_ref, m_ref, s_ref, cov_ref, acc_ref):
        c = pl.program_id(1)

        @pl.when(c == 0)
        def _init():
            acc_ref[...] = jnp.zeros_like(acc_ref)

        # (TI, NT) @ (NT, NT): contraction over the left fine-grid axis.
        t = jnp.dot(q_ref[...], covu_ref[...],
                    preferred_element_type=jnp.float32)
        # (TI, NT) @ (NT, N*m): pre-transposed right operand, lane-dense output.
        acc_ref[...] += jnp.dot(t.astype(compute_dtype), qt_ref[...],
                                preferred_element_type=jnp.float32)

        @pl.when(c == pl.num_programs(1) - 1)
        def _fin():
            # fused low-rank term: M_tile (TI, npad) @ (covar_x0 M^T) (npad, N*m)
            cov_ref[...] = acc_ref[...] + jnp.dot(
                m_ref[...], s_ref[...], preferred_element_type=jnp.float32)

    return kernel


def _pick_tile(dim, prefs):
    for t in prefs:
        if t <= dim and dim % t == 0:
            return t
    return dim  # full extent is always legal w.r.t. the (8,128) rule


def segp_cov_pallas(covar_U, Qc, QcT, M_pad, S_pad):
    """cov (N*m, N*m) f32 = sum_c Qc[c] @ covar_U @ Qc[c]^T + M covar_x0 M^T."""
    p, Nm, NT = Qc.shape
    npad = M_pad.shape[1]
    compute_dtype = Qc.dtype
    itemsize = jnp.dtype(compute_dtype).itemsize

    TI = _pick_tile(Nm, (512, 256, 128, 64, 32, 16, 8))  # sublane-aligned rows
    grid = (Nm // TI, p)

    flops = int(2 * p * Nm * NT * NT + 2 * p * Nm * Nm * NT + 2 * Nm * Nm * npad)
    bytes_accessed = int(
        NT * NT * itemsize                        # covar_U (constant block)
        + p * Nm * NT * itemsize                  # Q row blocks
        + (Nm // TI) * p * NT * Nm * itemsize     # Q^T re-fetched per row tile
        + 2 * Nm * npad * 4                       # M tiles + covar_x0 M^T
        + Nm * Nm * 4)                            # output

    return pl.pallas_call(
        _make_cov_kernel(compute_dtype),
        out_shape=jax.ShapeDtypeStruct((Nm, Nm), jnp.float32),
        grid_spec=pltpu.PrefetchScalarGridSpec(
            num_scalar_prefetch=0,
            grid=grid,
            in_specs=[
                pl.BlockSpec((NT, NT), lambda i, c: (0, 0)),            # covar_U
                pl.BlockSpec((None, TI, NT), lambda i, c: (c, i, 0)),   # Q rows
                pl.BlockSpec((None, NT, Nm), lambda i, c: (c, 0, 0)),   # Q^T (full width)
                pl.BlockSpec((TI, npad), lambda i, c: (i, 0)),          # M rows (f32)
                pl.BlockSpec((npad, Nm), lambda i, c: (0, 0)),          # covar_x0 M^T (f32)
            ],
            out_specs=pl.BlockSpec((TI, Nm), lambda i, c: (i, 0)),
            scratch_shapes=[pltpu.VMEM((TI, Nm), jnp.float32)],
        ),
        compiler_params=pltpu.CompilerParams(
            dimension_semantics=("parallel", "arbitrary"),
            vmem_limit_bytes=64 * 1024 * 1024,
        ),
        cost_estimate=pl.CostEstimate(
            flops=flops, transcendentals=0, bytes_accessed=bytes_accessed),
    )(covar_U, Qc, QcT, M_pad, S_pad)


# ---------------------------------------------------------------------------
# Parametrizations (glue, matches nn.Module init)
# ---------------------------------------------------------------------------
def L_param(Z):
    return jnp.tril(Z, -1) + jnp.diag(jnp.abs(jnp.diag(Z)))


def L_plus_param(Z):
    return L_param(Z) + 0.001 * jnp.eye(Z.shape[0], dtype=Z.dtype)


def skew_param(Z):
    U = jnp.triu(Z, 1)
    return U - U.T


def non_negative_param(Z):
    return jnp.abs(Z)


def get_AP(V1w, V2w, V3w):
    n = V1w.shape[0]
    eps = 0.001 * jnp.eye(n, dtype=V1w.dtype)
    V1_inv = jnp.linalg.inv(V1w + eps)
    P_inv = V1_inv.T @ V1_inv
    A = V2w @ V2w.T
    A = -0.5 * (P_inv @ A) + P_inv @ V3w
    return A


# ---------------------------------------------------------------------------
# Operand construction (glue: expm, trapezoid weights, Green's functions)
# ---------------------------------------------------------------------------
def build_operands(A, B, C, D, T, dT_idx, lt):
    NT = T.shape[0]
    step = T[1] - T[0]

    # TODO(synk): torch.linalg.matrix_exp has no Pallas primitive; computed in
    # glue with jax.scipy.linalg.expm.
    taus = jnp.arange(NT, dtype=jnp.float32) * step
    Ed = jax.vmap(jax.scipy.linalg.expm)(A[None, :, :] * taus[:, None, None])

    # Green's functions G_d = C expm(A d step) B, shape (NT, m, p)
    G = jnp.einsum('mn,dnk,kp->dmp', C, Ed, B)

    # SE kernel over the fine time grid
    covar_U = jnp.exp(-0.5 * (T[:, None] - T[None, :]) ** 2 / (lt * lt))

    # trapezoid weights (torch.trapezoid: length-1 integral == 0)
    a = jnp.arange(NT)
    k = dT_idx
    inside = a[None, :] <= k[:, None]
    endpoint = (a[None, :] == 0) | (a[None, :] == k[:, None])
    w = step * jnp.where(inside, jnp.where(endpoint, 0.5, 1.0), 0.0)
    w = jnp.where(k[:, None] > 0, w, 0.0)                       # (N, NT)

    gidx = jnp.clip(k[:, None] - a[None, :], 0, NT - 1)
    F = w[:, :, None, None] * G[gidx]                           # (N, NT, m, p)
    delta = (a[None, :] == k[:, None]).astype(jnp.float32)
    Q = F + delta[:, :, None, None] * D[None, None, :, :]       # (N, NT, m, p)

    CE = jnp.einsum('mn,ink->imk', C, Ed[k])                    # (N, m, n)
    return F, Q, CE, covar_U


# ---------------------------------------------------------------------------
# Forward pass (SEGP.forward): Pallas for the hot covariance contraction,
# XLA glue for expm, tiny mean matvecs, final reorder + jitter.
# ---------------------------------------------------------------------------
def segp_forward(A, B, C, D, T, dT_idx, lt, mean_x0, covar_x0,
                 mean_U, mean_dU, *, compute_dtype=jnp.bfloat16):
    """Returns (mean_prior (N, m), covar_prior (m*N, m*N)) as in SEGP.forward."""
    NT = T.shape[0]
    N = dT_idx.shape[0]
    m, n = C.shape
    p = B.shape[1]
    Nm = N * m

    F, Q, CE, covar_U = build_operands(A, B, C, D, T, dT_idx, lt)

    # --- covariance hot path (Pallas) ---
    # Qc[c, i*m + r, a] = Q[i, a, r, c]
    Qc = jnp.transpose(Q, (3, 0, 2, 1)).reshape(p, Nm, NT)
    QcT = jnp.transpose(Qc, (0, 2, 1))                          # (p, NT, N*m)

    # low-rank initial-condition operands (f32, tiny contraction padded to 8)
    M = CE.reshape(Nm, n).astype(jnp.float32)
    S = (covar_x0.astype(jnp.float32) @ M.T)                    # (n, N*m)
    npad = max(8, ((n + 7) // 8) * 8)
    M_pad = jnp.zeros((Nm, npad), jnp.float32).at[:, :n].set(M)
    S_pad = jnp.zeros((npad, Nm), jnp.float32).at[:n, :].set(S)

    cov_flat = segp_cov_pallas(covar_U.astype(compute_dtype),
                               Qc.astype(compute_dtype),
                               QcT.astype(compute_dtype),
                               M_pad, S_pad)                    # f32 (N*m, N*m)

    # reorder (i,r),(j,s) -> (r,i),(s,j) and add the 1e-5 jitter (one XLA pass)
    covar_prior = (cov_flat.reshape(N, m, N, m).transpose(1, 0, 3, 2)
                   .reshape(m * N, m * N))
    covar_prior = covar_prior + 1e-5 * jnp.eye(m * N, dtype=covar_prior.dtype)

    # mean: three matvec-scale terms (lane-width-1 outputs) -> plain XLA
    mean_prior = (jnp.einsum('imn,n->im', CE, mean_x0)
                  + jnp.einsum('iamp,ap->im', F, mean_U)
                  + mean_dU @ D.T)
    return mean_prior, covar_prior


# Pure-JAX reference (materializes the kron matrix) for correctness checking.
def segp_forward_ref(A, B, C, D, T, dT_idx, lt, mean_x0, covar_x0,
                     mean_U, mean_dU):
    NT = T.shape[0]
    N = dT_idx.shape[0]
    m, n = C.shape
    p = B.shape[1]
    F, Q, CE, covar_U = build_operands(A, B, C, D, T, dT_idx, lt)
    Qf = jnp.transpose(Q, (0, 2, 1, 3)).reshape(N * m, NT * p)
    Kp = jnp.kron(covar_U, jnp.eye(p, dtype=covar_U.dtype))
    M = CE.reshape(N * m, n)
    cov_flat = Qf @ Kp @ Qf.T + M @ covar_x0 @ M.T
    covar_prior = (cov_flat.reshape(N, m, N, m).transpose(1, 0, 3, 2)
                   .reshape(m * N, m * N)) + 1e-5 * jnp.eye(m * N)
    mean_prior = (jnp.einsum('imn,n->im', CE, mean_x0)
                  + jnp.einsum('iamp,ap->im', F, mean_U)
                  + mean_dU @ D.T)
    return mean_prior, covar_prior


# ---------------------------------------------------------------------------
# Demo
# ---------------------------------------------------------------------------
if __name__ == "__main__":
    m, n, p = 2, 3, 2       # output / state / input dims
    NT = 32                 # fine time grid size
    tmax = 0.7
    lt = 0.5

    T = jnp.linspace(0.0, tmax, NT).astype(jnp.float32)
    dT_idx = jnp.arange(0, NT, 2, dtype=jnp.int32)   # dT = every other grid point
    N = int(dT_idx.shape[0])                          # 16 -> N*m = 32

    key = jax.random.PRNGKey(0)
    keys = jax.random.split(key, 9)
    V1_raw = jnp.eye(n, dtype=jnp.float32) + 0.1 * jax.random.normal(keys[0], (n, n))
    V2_raw = 0.3 * jax.random.normal(keys[1], (n, n))
    V3_raw = 0.3 * jax.random.normal(keys[2], (n, n))
    B_raw = 0.5 * jax.random.normal(keys[3], (n, p))
    C_w = 0.5 * jax.random.normal(keys[4], (m, n))
    D_raw = 0.5 * jax.random.normal(keys[5], (m, p))
    mean_x0 = jax.random.normal(keys[6], (n,))
    W = jax.random.normal(keys[7], (n, n))
    covar_x0 = 0.1 * jnp.eye(n, dtype=jnp.float32) + 0.01 * (W @ W.T)

    # parametrized parameters (A learnt via V1/V2/V3; B, D non-negative)
    V1w = L_plus_param(V1_raw)
    V2w = L_param(V2_raw)
    V3w = skew_param(V3_raw)
    A = get_AP(V1w, V2w, V3w)
    B = non_negative_param(B_raw)
    C = C_w
    D = non_negative_param(D_raw)

    mean_U = jax.random.normal(keys[8], (NT, p)).astype(jnp.float32)
    mean_dU = mean_U[dT_idx]

    args = (A, B, C, D, T, dT_idx, lt, mean_x0, covar_x0, mean_U, mean_dU)

    # f32 kernel path vs pure-JAX reference (meaningful, O(1)-scale values)
    mean_f32, cov_f32 = segp_forward(*args, compute_dtype=jnp.float32)
    mean_ref, cov_ref = segp_forward_ref(*args)
    jax.block_until_ready((mean_f32, cov_f32, mean_ref, cov_ref))
    assert bool(jnp.allclose(cov_f32, cov_ref, rtol=2e-3, atol=1e-5)), \
        "f32 Pallas covariance mismatch vs reference"
    assert bool(jnp.allclose(mean_f32, mean_ref, rtol=1e-4, atol=1e-6)), \
        "mean mismatch vs reference"

    # default bf16-input / f32-accumulate MXU path
    mean_prior, covar_prior = segp_forward(*args)
    jax.block_until_ready((mean_prior, covar_prior))

    assert mean_prior.shape == (N, m)
    assert covar_prior.shape == (m * N, m * N)
    assert bool(jnp.all(jnp.isfinite(mean_prior)))
    assert bool(jnp.all(jnp.isfinite(covar_prior)))
    print("KERNEL_OK")
</pallas_src>

<mosaic_0001>
module attributes {stable_mosaic.version = 11 : i64} {
  func.func @kernel(%arg0: i32, %arg1: i32, %arg2: memref<32x32xf32, #tpu.memory_space<vmem>>, %arg3: memref<1x32x32xf32, #tpu.memory_space<vmem>>, %arg4: memref<1x32x32xf32, #tpu.memory_space<vmem>>, %arg5: memref<32x8xf32, #tpu.memory_space<vmem>>, %arg6: memref<8x32xf32, #tpu.memory_space<vmem>>, %arg7: memref<32x32xf32, #tpu.memory_space<vmem>>, %arg8: memref<32x32xf32, #tpu.memory_space<vmem>>) attributes {dimension_semantics = [#tpu.dimension_semantics<parallel>, #tpu.dimension_semantics<arbitrary>], iteration_bounds = array<i64: 1, 2>, scalar_prefetch = 0 : i64, scratch_operands = 1 : i64, tpu.core_type = #tpu.core_type<tc>, window_params = [{pipeline_mode = #tpu.pipeline_mode<synchronous>, transform_indices = @transform_0, window_bounds = array<i64: 32, 32>}, {transform_indices = @transform_1, window_bounds = array<i64: 1, 32, 32>}, {transform_indices = @transform_2, window_bounds = array<i64: 1, 32, 32>}, {transform_indices = @transform_3, window_bounds = array<i64: 32, 8>}, {pipeline_mode = #tpu.pipeline_mode<synchronous>, transform_indices = @transform_4, window_bounds = array<i64: 8, 32>}, {transform_indices = @transform_5, window_bounds = array<i64: 32, 32>}]} {
    %c0_i32 = arith.constant 0 : i32
    %0 = arith.cmpi eq, %arg1, %c0_i32 : i32
    %1 = arith.extui %0 : i1 to i32
    %c0_i32_0 = arith.constant 0 : i32
    %2 = arith.cmpi ne, %1, %c0_i32_0 : i32
    scf.if %2 {
      %cst_14 = arith.constant 0.000000e+00 : f32
      %16 = vector.broadcast %cst_14 : f32 to vector<32x32xf32>
      %c0_15 = arith.constant 0 : index
      %c0_16 = arith.constant 0 : index
      %17 = vector.load %arg8[%c0_15, %c0_16] : memref<32x32xf32, #tpu.memory_space<vmem>>, vector<32x32xf32>
      tpu.vector_store %arg8[%c0_15, %c0_16], %16 {strides = array<i32>} : memref<32x32xf32, #tpu.memory_space<vmem>>, vector<32x32xf32>,
    } else {
    }
    %c0 = arith.constant 0 : index
    %c0_1 = arith.constant 0 : index
    %c0_2 = arith.constant 0 : index
    %3 = vector.load %arg3[%c0, %c0_1, %c0_2] : memref<1x32x32xf32, #tpu.memory_space<vmem>>, vector<1x32x32xf32>
    %4 = vector.shape_cast %3 : vector<1x32x32xf32> to vector<32x32xf32>
    %c0_3 = arith.constant 0 : index
    %c0_4 = arith.constant 0 : index
    %5 = vector.load %arg2[%c0_3, %c0_4] : memref<32x32xf32, #tpu.memory_space<vmem>>, vector<32x32xf32>
    %cst = arith.constant dense<0.000000e+00> : vector<32x32xf32>
    %6 = tpu.matmul %4, %5, %cst {dimension_numbers = #tpu.dot_dimension_numbers<[1], [0], [0], [1], [0, 0, 1, 1], [], []>} : vector<32x32xf32>, vector<32x32xf32>, vector<32x32xf32> -> vector<32x32xf32>
    %c0_5 = arith.constant 0 : index
    %c0_6 = arith.constant 0 : index
    %7 = vector.load %arg8[%c0_5, %c0_6] : memref<32x32xf32, #tpu.memory_space<vmem>>, vector<32x32xf32>
    %c0_7 = arith.constant 0 : index
    %c0_8 = arith.constant 0 : index
    %c0_9 = arith.constant 0 : index
    %8 = vector.load %arg4[%c0_7, %c0_8, %c0_9] : memref<1x32x32xf32, #tpu.memory_space<vmem>>, vector<1x32x32xf32>
    %9 = vector.shape_cast %8 : vector<1x32x32xf32> to vector<32x32xf32>
    %cst_10 = arith.constant dense<0.000000e+00> : vector<32x32xf32>
    %10 = tpu.matmul %6, %9, %cst_10 {dimension_numbers = #tpu.dot_dimension_numbers<[1], [0], [0], [1], [0, 0, 1, 1], [], []>} : vector<32x32xf32>, vector<32x32xf32>, vector<32x32xf32> -> vector<32x32xf32>
    %11 = arith.addf %7, %10 : vector<32x32xf32>
    %c0_11 = arith.constant 0 : index
    %c0_12 = arith.constant 0 : index
    %12 = vector.load %arg8[%c0_11, %c0_12] : memref<32x32xf32, #tpu.memory_space<vmem>>, vector<32x32xf32>
    tpu.vector_store %arg8[%c0_11, %c0_12], %11 {strides = array<i32>} : memref<32x32xf32, #tpu.memory_space<vmem>>, vector<32x32xf32>,
    %c1_i32 = arith.constant 1 : i32
    %13 = arith.cmpi eq, %arg1, %c1_i32 : i32
    %14 = arith.extui %13 : i1 to i32
    %c0_i32_13 = arith.constant 0 : i32
    %15 = arith.cmpi ne, %14, %c0_i32_13 : i32
    scf.if %15 {
      %c0_14 = arith.constant 0 : index
      %c0_15 = arith.constant 0 : index
      %16 = vector.load %arg8[%c0_14, %c0_15] : memref<32x32xf32, #tpu.memory_space<vmem>>, vector<32x32xf32>
      %c0_16 = arith.constant 0 : index
      %c0_17 = arith.constant 0 : index
      %17 = vector.load %arg5[%c0_16, %c0_17] : memref<32x8xf32, #tpu.memory_space<vmem>>, vector<32x8xf32>
      %c0_18 = arith.constant 0 : index
      %c0_19 = arith.constant 0 : index
      %18 = vector.load %arg6[%c0_18, %c0_19] : memref<8x32xf32, #tpu.memory_space<vmem>>, vector<8x32xf32>
      %cst_20 = arith.constant dense<0.000000e+00> : vector<32x32xf32>
      %19 = tpu.matmul %17, %18, %cst_20 {dimension_numbers = #tpu.dot_dimension_numbers<[1], [0], [0], [1], [0, 0, 1, 1], [], []>} : vector<32x8xf32>, vector<8x32xf32>, vector<32x32xf32> -> vector<32x32xf32>
      %20 = arith.addf %16, %19 : vector<32x32xf32>
      %c0_21 = arith.constant 0 : index
      %c0_22 = arith.constant 0 : index
      %21 = vector.load %arg7[%c0_21, %c0_22] : memref<32x32xf32, #tpu.memory_space<vmem>>, vector<32x32xf32>
      tpu.vector_store %arg7[%c0_21, %c0_22], %20 {strides = array<i32>} : memref<32x32xf32, #tpu.memory_space<vmem>>, vector<32x32xf32>,
    } else {
    }
    return
  }
  func.func @transform_0(%arg0: i32, %arg1: i32) -> (i32, i32) {
    %c0_i32 = arith.constant 0 : i32
    %c0_i32_0 = arith.constant 0 : i32
    %c0_i32_1 = arith.constant 0 : i32
    return %c0_i32, %c0_i32_0 : i32, i32
  }
  func.func @transform_1(%arg0: i32, %arg1: i32) -> (i32, i32, i32) {
    %c0_i32 = arith.constant 0 : i32
    %c0_i32_0 = arith.constant 0 : i32
    return %arg1, %arg0, %c0_i32 : i32, i32, i32
  }
  func.func @transform_2(%arg0: i32, %arg1: i32) -> (i32, i32, i32) {
    %c0_i32 = arith.constant 0 : i32
    %c0_i32_0 = arith.constant 0 : i32
    %c0_i32_1 = arith.constant 0 : i32
    return %arg1, %c0_i32, %c0_i32_0 : i32, i32, i32
  }
  func.func @transform_3(%arg0: i32, %arg1: i32) -> (i32, i32) {
    %c0_i32 = arith.constant 0 : i32
    %c0_i32_0 = arith.constant 0 : i32
    return %arg0, %c0_i32 : i32, i32
  }
  func.func @transform_4(%arg0: i32, %arg1: i32) -> (i32, i32) {
    %c0_i32 = arith.constant 0 : i32
    %c0_i32_0 = arith.constant 0 : i32
    %c0_i32_1 = arith.constant 0 : i32
    return %c0_i32, %c0_i32_0 : i32, i32
  }
  func.func @transform_5(%arg0: i32, %arg1: i32) -> (i32, i32) {
    %c0_i32 = arith.constant 0 : i32
    %c0_i32_0 = arith.constant 0 : i32
    return %arg0, %c0_i32 : i32, i32
  }
}

</mosaic_0001>

<bundles_post_ra>
// kernel: tpu_custom_call.1
= control target key start
LH: loop header
LB: loop body
LE: loop exit
PB: predicated region body
PF: predicated region fallthrough
CT: control target
= control target key end

     0   :  { %10 = vsyncpa [#allocation4], 0  ;;  %s1316_s0 = inlined_call_operand.vmem [shape: f32[32,32], index: 0, kind: input, shape index: {}]   ;;  %s1317_s1 = inlined_call_operand.hbm [shape: f32[2,32,32], index: 1, kind: input, shape index: {}]   ;;  %s1318_s2 = inlined_call_operand.hbm [shape: f32[2,32,32], index: 2, kind: input, shape index: {}]   ;;  %s1319_s3 = inlined_call_operand.vmem [shape: f32[32,8], index: 3, kind: input, shape index: {}]   ;;  %s1320_s4 = inlined_call_operand.vmem [shape: f32[8,32], index: 4, kind: input, shape index: {}]   ;;  %s1321_s5 = inlined_call_operand.hbm [shape: f32[32,32], index: 5, kind: output, shape index: {}]  }
   0x1   :  { %12 = vsyncpa [#allocation4 + $0x1], 0 }
   0x2   :  { %13 = vsyncpa [#allocation7], 0 }
   0x3   :  { %15 = vsyncpa [#allocation7 + $0x1], 0 }
   0x4   :  { %16 = vsyncpa [#allocation5], 0  ;;  %s1119_s18 = smov 0   ;;  %s1121_s19 = smov 0  }
   0x5   :  { %s1123_s20 = smov 0   ;;  %s1125_s21 = smov 0  }
   0x6   :  { %s1127_s22 = smov 0   ;;  %s1129_s23 = smov 0  }
   0x7 LB: > { %s1322_s24 = sadd.s32 4294967295, %s1079_s23   ;;  %s31_s25 = sadd.s32 1, %s1075_s22  ;;  %s1079_s23 = sphi %s1129_s23, %s22_s23   ;;  %s1075_s22 = sphi %s1127_s22, %s1333_s22   ;;  %s1071_s21 = sphi %s1125_s21, %s1332_s21   ;;  %s1067_s20 = sphi %s1123_s20, %s1331_s20   ;;  %s1063_s19 = sphi %s1121_s19, %s1330_s19   ;;  %s1059_s18 = sphi %s1119_s18, %s1329_s18  }
   0x8   : > { %p32_p0 = scmp.ge.s32.totalorder %s31_s25, 2  ;;  %s64_s26 = sadd.s32 1, %s1067_s20 }
   0x9   : > { %p71_p1 = scmp.ne.s32.totalorder %s1067_s20, %s1063_s19  ;;  %p72_p2 = scmp.eq.s32.totalorder %s1079_s23, 0 }
   0xa   : > { %s1335_s25 = smov (%p32_p0, %s31_s25), 0  ;;  %p77_p4 = scmp.ne.s32.totalorder %s1063_s19, %s1059_s18 }
   0xb   : > { %p1155_p3 = por %p72_p2, %p71_p1  ;;  %s59_s28 = ssub.s32 %s1075_s22, %s1335_s25 }
   0xc   : > { %p78_p5 = scmp.eq.s32.totalorder %s1322_s24, 0  ;;  %p62_p6 = scmp.eq.s32.totalorder %s59_s28, 0 }
   0xd   : > { %p884_p8 = scmp.lt.s32.totalorder %s1079_s23, 2  ;;  %s1173_s6 = sand.u32 1, %s1067_s20  }
   0xe   : > { %p1164_p7 = por %p78_p5, %p77_p4  ;;  %s808_s7 = sshll.u32 %s1075_s22, 9 }
   0xf   : > { %s1170_s30 = scalar_select %p62_p6, %s1067_s20, %s64_s26  }
  0x10   : > { %s781_s8 = sshll.u32 %s1173_s6, 5  ;;  %s227_s11 = scalar_lea.hbm %s1317_s1, %s808_s7 }
  0x11   : > { %s219_s12 = scalar_lea.vmem [#allocation3], %s781_s8  ;;  %p1184_p9 = pnand %p884_p8, %p1155_p3 }
  0x12   : > { %s228_s13 = sshll.u32 %s219_s12, 4  ;;  %s216_s15 = scalar_lea.sflag [#allocation4], %s1173_s6  ;;  %s229_s13 = int_to_ptr.vmem [resolvable:$true] %s228_s13 }
  0x13   : > { %p943_p10 = pneg %p1184_p9  ;;  %s954_s16 = scalar_lea.vmem %s229_s13, 512 }
  0x14   : > { %p955_p11 = scmp.ne.s32.totalorder %s229_s13, %s954_s16  ;;  %s1081_s17 = smov [#allocation3]  }
  0x15   : > { %s959_s18 = sshll.u32 %s1081_s17, 4  ;;  %s960_s18 = int_to_ptr.vmem [resolvable:$false] %s959_s18 }
  0x16   : > { %p957_p12 = pnand %p955_p11, %p943_p10  ;;  %s961_s26 = scalar_lea.vmem %s960_s18, 1024 }
  0x17   : > { %p962_p0 = scmp.lt.s32.totalorder %s229_s13, %s960_s18  ;;  %p963_p1 = scmp.lt.s32.totalorder %s961_s26, %s954_s16 }
  0x18   : > { %p958_p13 = pneg %p957_p12 }
  0x19   : > { %p964_p2 = por %p963_p1, %p962_p0 }
  0x1b   : > { %p965_p3 = pnand %p964_p2, %p958_p13 }
  0x1d   : > { %968 = shalt.err (!%p965_p3)
}
  0x1e   : > { %s1082_s27 = smov 128   ;;  %s1083_s28 = smov 8  }
  0x1f   : > { %880 = dma.hbm_to_vmem [thread:$0]  (!%p1184_p9), %s227_s11, 512, %s229_s13, %s216_s15, %s1082_s27, %s1082_s27, %s1083_s28  }
  0x20   : > { %p787_p4 = scmp.ge.s32.totalorder %s1079_s23, 1  ;;  %p257_p5 = scmp.lt.s32.totalorder %s1079_s23, 3 }
  0x21   : > { %s248_s16 = scalar_lea.hbm %s1318_s2, %s808_s7  ;;  %s242_s17 = scalar_lea.vmem [#allocation6], %s781_s8 }
  0x22   : > { %p1198_p6 = pnand %p787_p4, %p257_p5  ;;  %s249_s18 = sshll.u32 %s242_s17, 4  ;;  %s250_s18 = int_to_ptr.vmem [resolvable:$true] %s249_s18 }
  0x23   : > { %s239_s26 = scalar_lea.sflag [#allocation7], %s1173_s6  ;;  %s982_s24 = scalar_lea.vmem %s250_s18, 512 }
  0x24   : > { %p983_p8 = scmp.ne.s32.totalorder %s250_s18, %s982_s24  ;;  %s1084_s11 = smov [#allocation6]  }
  0x25   : > { %s987_s13 = sshll.u32 %s1084_s11, 4  ;;  %s988_s13 = int_to_ptr.vmem [resolvable:$false] %s987_s13 }
  0x26   : > { %p985_p11 = pnand %p983_p8, %p943_p10  ;;  %s989_s15 = scalar_lea.vmem %s988_s13, 1024 }
  0x27   : > { %p990_p13 = scmp.lt.s32.totalorder %s250_s18, %s988_s13  ;;  %p991_p0 = scmp.lt.s32.totalorder %s989_s15, %s982_s24 }
  0x28   : > { %p986_p12 = pneg %p985_p11 }
  0x29   : > { %p992_p1 = por %p991_p0, %p990_p13 }
  0x2b   : > { %p993_p2 = pnand %p992_p1, %p986_p12 }
  0x2d   : > { %996 = shalt.err (!%p993_p2)
}
  0x2e   : > { %883 = dma.hbm_to_vmem [thread:$0]  (!%p1184_p9), %s248_s16, 512, %s250_s18, %s239_s26, %s1082_s27, %s1082_s27, %s1083_s28  }
  0x2f   : > { %261 = sbr.rel (%p1198_p6) target bundleno = 690 (0x2b2), region = 40  ;;  %s263_s6 = sand.u32 (!%p1198_p6), 1, %s1063_s19  }
  0x30   : > { %s788_s7 = sshll.u32 (!%p1198_p6), %s263_s6, 5  ;;  %s264_s8 = scalar_lea.sflag (!%p1198_p6), [#allocation4], %s263_s6 }
  0x31   : > { %s1216_s10 = scalar_lea.vmem (!%p1198_p6), [#allocation3], %s788_s7 }
  0x34   : > { %1046 = dma.done.wait (%p1164_p7), %s264_s8, 512  }
  0x35   : > { %1048 = vsyncadd (%p1164_p7), %s264_s8, 4294966784  ;;  %s273_s24 = scalar_lea.sflag [#allocation7], %s263_s6  ;;  %s1222_s12 = scalar_lea.vmem [#allocation6], %s788_s7 }
  0x36   : > { %1050 = dma.done.wait (%p1164_p7), %s273_s24, 512  }
  0x37   : > { %1052 = vsyncadd (%p1164_p7), %s273_s24, 4294966784  ;;  %p790_p9 = scmp.ne.s32.totalorder %s1071_s21, 0 }
  0x39   : > { %319 = sbr.rel (%p790_p9) target bundleno = 65 (0x41), region = 52 }
  0x3e   : > { %vm320_vm0 = vcmask 261120   ;;  %v1085_v0 = vmov 0.0  }
  0x3f   : > { %321 = vst.msk [vmem:[#allocation2] sm:$0xff] %vm320_vm0, %v1085_v0  ;;  %322 = vst.msk [vmem:[#allocation2 + $0x8] sm:$0xff] %vm320_vm0, %v1085_v0 }
  0x40   : > { %323 = vst.msk [vmem:[#allocation2 + $0x10] sm:$0xff] %vm320_vm0, %v1085_v0  ;;  %324 = vst.msk [vmem:[#allocation2 + $0x18] sm:$0xff] %vm320_vm0, %v1085_v0 }
  0x41 PF: > { %v332_v1 = vld [vmem:[%s1316_s0 + $0x18] sm:$0xff]  ;;  %v331_v2 = vld [vmem:[%s1316_s0 + $0x10] sm:$0xff]  ;;  %vm333_vm1 = vcmask 261120   ;;  %v325_v3 = vld [vmem:[%s1216_s10] sm:$0xff]  ;;  %p799_p7 = scmp.ne.s32.totalorder %s1071_s21, 1 }
  0x42   : > { %831 = vmatprep.subr.mxu0 %v332_v1  ;;  %v330_v4 = vld [vmem:[%s1316_s0 + $0x8] sm:$0xff]  ;;  %839 = vmatprep.mubr.msk.f32.mxu0 %vm333_vm1, %v325_v3  ;;  %v438_v5 = vld [vmem:[%s1222_s12 + $0x18] sm:$0xff]  ;;  %v437_v6 = vld [vmem:[%s1222_s12 + $0x10] sm:$0xff] }
  0x43   : > { %832 = vmatpush3.msra.mxu0 %v332_v1  ;;  %845 = vmatprep.subr.mxu1 %v438_v5  ;;  %v329_v7 = vld [vmem:[%s1316_s0] sm:$0xff]  ;;  %v326_v8 = vld [vmem:[%s1216_s10 + $0x8] sm:$0xff]  ;;  %v327_v9 = vld [vmem:[%s1216_s10 + $0x10] sm:$0xff] }
  0x44   : > { %833 = vmatprep.subr.mxu0 %v331_v2  ;;  %846 = vmatpush3.msra.mxu1 %v438_v5  ;;  %v328_v10 = vld [vmem:[%s1216_s10 + $0x18] sm:$0xff]  ;;  %v436_v11 = vld [vmem:[%s1222_s12 + $0x8] sm:$0xff]  ;;  %v435_v12 = vld [vmem:[%s1222_s12] sm:$0xff] }
  0x45   : > { %834 = vmatpush3.msra.mxu0 %v331_v2  ;;  %847 = vmatprep.subr.mxu1 %v437_v6 }
  0x46   : > { %835 = vmatprep.subr.mxu0 %v330_v4  ;;  %848 = vmatpush3.msra.mxu1 %v437_v6  ;;  %v432_v17 = vld [vmem:[#allocation2 + $0x8] sm:$0xff]  ;;  %v431_v19 = vld [vmem:[#allocation2] sm:$0xff] }
  0x47   : > { %836 = vmatpush3.msra.mxu0 %v330_v4  ;;  %849 = vmatprep.subr.mxu1 %v436_v11  ;;  %v434_v22 = vld [vmem:[#allocation2 + $0x18] sm:$0xff]  ;;  %v433_v25 = vld [vmem:[#allocation2 + $0x10] sm:$0xff] }
  0x48   : > { %837 = vmatprep.subr.mxu0 %v329_v7  ;;  %850 = vmatpush3.msra.mxu1 %v436_v11 }
  0x49   : > { %838 = vmatpush3.msra.mxu0 %v329_v7  ;;  %851 = vmatprep.subr.mxu1 %v435_v12 }
  0x4a   : > { %840 = vmatmul.mubr.msk.f32.vlgmr.msra.gmra.mxu0 %vm333_vm1, %v326_v8  ;;  %852 = vmatpush3.msra.mxu1 %v435_v12 }
  0x4b   : > { %842 = vmatprep.mubr.msk.f32.mxu0 %vm333_vm1, %v327_v9 }
  0x4e   : > { %843 = vmatmul.mubr.msk.f32.gmra.mxu0 %vm333_vm1, %v328_v10 }
 0x10a   : > { %v841_v13 = vpop.f32.mrf.mxu0 }
 0x10c   : > { %v412_v14 = vpop.f32.mrf.mxu0 }
 0x10d   : > { %853 = vmatprep.mubr.msk.f32.mxu1 %vm333_vm1, %v412_v14 }
 0x10e   : > { %v844_v15 = vpop.f32.mrf.mxu0  ;;  %854 = vmatmul.mubr.msk.f32.vlgmr.msra.gmra.mxu1 %vm333_vm1, %v841_v13 }
 0x110   : > { %v422_v16 = vpop.f32.mrf.mxu0 }
 0x111   : > { %856 = vmatprep.mubr.msk.f32.mxu1 %vm333_vm1, %v422_v16 }
 0x112   : > { %857 = vmatmul.mubr.msk.f32.gmra.mxu1 %vm333_vm1, %v844_v15 }
 0x1ce   : > { %v855_v18 = vpop.f32.mrf.mxu1 }
 0x1cf   : > { %v537_v20 = vadd.f32 %v855_v18, %v432_v17 }
 0x1d0   : > { %v517_v21 = vpop.f32.mrf.mxu1 }
 0x1d1   : > { %541 = vst.msk [vmem:[#allocation2 + $0x8] sm:$0xff] %vm333_vm1, %v537_v20  ;;  %v536_v23 = vadd.f32 %v517_v21, %v431_v19 }
 0x1d2   : > { %v858_v24 = vpop.f32.mrf.mxu1 }
 0x1d3   : > { %540 = vst.msk [vmem:[#allocation2] sm:$0xff] %vm333_vm1, %v536_v23  ;;  %v539_v26 = vadd.f32 %v858_v24, %v434_v22  ;;  %547 = sbr.rel (%p799_p7) target bundleno = 674 (0x2a2), region = 56 }
 0x1d4   : > { %v527_v27 = vpop.f32.mrf.mxu1 }
 0x1d5   : > { %543 = vst.msk [vmem:[#allocation2 + $0x18] sm:$0xff] %vm333_vm1, %v539_v26  ;;  %v538_v28 = vadd.f32 %v527_v27, %v433_v25 }
 0x1d7   : > { %542 = vst.msk [vmem:[#allocation2 + $0x10] sm:$0xff] %vm333_vm1, %v538_v28 }
 0x1d8   : > { %v556_v29 = vld [vmem:[%s1320_s4] sm:$0xff]  ;;  %vm557_vm2 = vcmask 64512   ;;  %v554_v31 = vld [vmem:[%s1319_s3 + $0x10] sm:$0xff]  ;;  %v553_v32 = vld [vmem:[%s1319_s3 + $0x8] sm:$0xff] }
 0x1d9   : > { %v552_v30 = vld [vmem:[%s1319_s3] sm:$0xff]  ;;  %859 = vmatprep.subr.mxu0 %v556_v29  ;;  %867 = vmatprep.subr.mxu1 %v556_v29  ;;  %v555_v33 = vld [vmem:[%s1319_s3 + $0x18] sm:$0xff]  ;;  %v549_v34 = vld [vmem:[#allocation2 + $0x8] sm:$0xff] }
 0x1da   : > { %860 = vmatpush3.msra.mxu0 %v556_v29  ;;  %868 = vmatpush3.msra.mxu1 %v556_v29  ;;  %v548_v38 = vld [vmem:[#allocation2] sm:$0xff] }
 0x1db   : > { %861 = vmatprep.mubr.msk.f32.mxu0 %vm557_vm2, %v552_v30  ;;  %864 = vmatprep.mubr.msk.f32.mxu1 %vm557_vm2, %v554_v31 }
 0x1dc   : > { %862 = vmatmul.mubr.msk.f32.vlgmr.msra.gmra.mxu0 %vm557_vm2, %v553_v32  ;;  %865 = vmatmul.mubr.msk.f32.vlgmr.msra.gmra.mxu1 %vm557_vm2, %v555_v33  ;;  %v551_v35 = vld [vmem:[#allocation2 + $0x18] sm:$0xff] }
 0x1de   : > { %v550_v39 = vld [vmem:[#allocation2 + $0x10] sm:$0xff] }
 0x29c   : > { %v863_v36 = vpop.f32.mrf.mxu0  ;;  %v866_v37 = vpop.f32.mrf.mxu1 }
 0x29d   : > { %v656_v40 = vadd.f32 %v863_v36, %v549_v34  ;;  %v658_v41 = vadd.f32 %v866_v37, %v551_v35 }
 0x29e   : > { %v636_v42 = vpop.f32.mrf.mxu0  ;;  %v646_v43 = vpop.f32.mrf.mxu1 }
 0x29f   : > { %660 = vst.msk [vmem:[#allocation8 + $0x8] sm:$0xff] %vm333_vm1, %v656_v40  ;;  %662 = vst.msk [vmem:[#allocation8 + $0x18] sm:$0xff] %vm333_vm1, %v658_v41  ;;  %v655_v44 = vadd.f32 %v636_v42, %v548_v38  ;;  %v657_v45 = vadd.f32 %v646_v43, %v550_v39 }
 0x2a1   : > { %659 = vst.msk [vmem:[#allocation8] sm:$0xff] %vm333_vm1, %v655_v44  ;;  %661 = vst.msk [vmem:[#allocation8 + $0x10] sm:$0xff] %vm333_vm1, %v657_v45 }
 0x2a2 PF: > { %s1327_s12 = sadd.s32 4294967295, %s1079_s23   ;;  %s1086_s27 = smov [#allocation8]  }
 0x2a3   : > { %p1283_p10 = scmp.eq.s32.totalorder %s1327_s12, 1  ;;  %s672_s28 = sshll.u32 %s1086_s27, 4  ;;  %s673_s28 = int_to_ptr.vmem [resolvable:$true] %s672_s28 }
 0x2a4   : > { %s997_s29 = scalar_lea.vmem %s673_s28, 512  ;;  %p1004_p6 = scmp.lt.s32.totalorder %s673_s28, %s673_s28 }
 0x2a5   : > { %p998_p3 = scmp.ne.s32.totalorder %s673_s28, %s997_s29  ;;  %p1005_p8 = scmp.lt.s32.totalorder %s997_s29, %s997_s29 }
 0x2a7   : > { %p999_p4 = pnand %p998_p3, %p1283_p10  ;;  %p1006_p11 = por %p1005_p8, %p1004_p6 }
 0x2a9   : > { %p1000_p5 = pneg %p999_p4 }
 0x2ab   : > { %p1007_p12 = pnand %p1006_p11, %p1000_p5 }
 0x2ad   : > { %1010 = shalt.err (!%p1007_p12)
}
 0x2ae   : > { %s1087_s9 = smov 128   ;;  %s1088_s16 = smov 8  }
 0x2af   : > { %874 = dma.vmem_to_hbm [thread:$0]  (%p1283_p10), %s673_s28, 512, %s1321_s5, [#allocation5], %s1087_s9, %s1087_s9, %s1088_s16  }
 0x2b0   : > { %1054 = dma.done.wait (%p1283_p10), [#allocation5], 512  }
 0x2b1   : > { %1056 = vsyncadd (%p1283_p10), [#allocation5], 4294966784 }
 0x2b2 PF: > { %s22_s23 = sadd.s32 1, %s1079_s23   ;;  %s1329_s18 = smov %s1063_s19 }
 0x2b3   : > { %p19_p13 = scmp.ge.s32.totalorder %s22_s23, 4   ;;  %s1330_s19 = smov %s1067_s20 }
 0x2b4   : > { %s1331_s20 = smov %s1170_s30  ;;  %s1332_s21 = smov %s1075_s22 }
 0x2b5   : > { %s1333_s22 = smov %s1335_s25  ;;  %21 = sbr.rel (!%p19_p13) target bundleno = 7 (0x7), region = 102 }
 0x2ba   :  { %688 = vsyncpa [#allocation4], 1 }
 0x2bb   :  { %690 = vsyncpa [#allocation4 + $0x1], 1 }
 0x2bc   :  { %691 = vsyncpa [#allocation7], 1 }
 0x2bd   :  { %693 = vsyncpa [#allocation7 + $0x1], 1 }
 0x2be   :  { %694 = vsyncpa [#allocation5], 1 }
 0x2bf   :  { %696 = vsyncpa [#allocation5 + $0x1], 1 }

</bundles_post_ra>
